<compile_context>
chip_gen: v6e
topology: v6e:2x2x1
jax: 0.10.0
libtpu: 0.0.40
codegen_flags: <defaults>
</compile_context>

<pallas_src>
import functools

import jax
import jax.numpy as jnp
import numpy as np
from jax.experimental import pallas as pl
from jax.experimental.pallas import tpu as pltpu


# ----------------------------------------------------------------------------
# Pallas kernel: 4 block matmuls + tanh + one fused VPU add
# ----------------------------------------------------------------------------
def _sse_dyn_aug_kernel(
    xu_ref,      # (TB, Nx+Nu)        pre-concatenated [x_known | u]
    xl_ref,      # (TB, Nxh)          learned (hidden) state
    w1_ref,      # (Nx+Nu, Nz+Nx+Ny)  -> [z | f_x | h_x]
    w2x_ref,     # (Nxh,   Nw+Nxh)    -> [w | pre_tanh] contribution from x_learn
    w2z_ref,     # (Nz,    Nw+Nxh)    -> [w | pre_tanh] contribution from z
    b2_ref,      # (1,     Nw+Nxh)    fused [bw | bh]
    w3_ref,      # (Nw,    Nx+Ny)     -> [xk_corr | y_corr]
    fh_ref,      # out: (TB, Nx+Ny)   [x_known_plus | y_k]
    xlp_ref,     # out: (TB, Nxh)     x_learn_plus
    *, nz, nw,
):
    f32 = jnp.float32
    xu = xu_ref[...]
    xl = xl_ref[...]

    # Stage 1: [z | f_x | h_x] = [x_known, u] @ W1
    combo1 = jnp.dot(xu, w1_ref[...], preferred_element_type=f32)
    z = combo1[:, :nz]
    fh = combo1[:, nz:]                 # [f_x | h_x]  (TB, Nx+Ny)

    # Stage 2: [w | pre_tanh] = x_learn @ W2x + z @ W2z + [bw | bh]
    combo2 = (
        jnp.dot(xl, w2x_ref[...], preferred_element_type=f32)
        + jnp.dot(z, w2z_ref[...], preferred_element_type=f32)
        + b2_ref[...]
    )
    w = combo2[:, :nw]                  # starts at lane 0 -> feeds MXU directly
    xl_plus = jnp.tanh(combo2[:, nw:])  # EUP

    # Stage 3: [xk_corr | y_corr] = w @ W3; combine with known-system terms
    corr = jnp.dot(w, w3_ref[...], preferred_element_type=f32)

    fh_ref[...] = fh + corr             # [x_known_plus | y_k], one dense store
    xlp_ref[...] = xl_plus


# ----------------------------------------------------------------------------
# One-time parameter preprocessing (hoisted out of the per-step call)
# ----------------------------------------------------------------------------
def prepare_params(p):
    """Build the fused, pre-transposed block weights. Call once at setup."""
    f32 = jnp.float32
    W1 = jnp.concatenate(
        [
            jnp.concatenate([p["Cz"].T, p["A"].T, p["C"].T], axis=1),   # rows: x_known
            jnp.concatenate([p["Dzu"].T, p["Bm"].T, p["D"].T], axis=1), # rows: u
        ],
        axis=0,
    ).astype(f32)
    W2x = jnp.concatenate([p["Wwx"].T, p["Whx"].T], axis=1).astype(f32)  # (Nxh, Nw+Nxh)
    W2z = jnp.concatenate([p["Wwz"].T, p["Whz"].T], axis=1).astype(f32)  # (Nz,  Nw+Nxh)
    b2 = jnp.concatenate([p["bw"], p["bh"]])[None, :].astype(f32)        # (1,   Nw+Nxh)
    W3 = jnp.concatenate([p["Bw"].T, p["Dyw"].T], axis=1).astype(f32)    # (Nw,  Nx+Ny)
    return {"W1": W1, "W2x": W2x, "W2z": W2z, "b2": b2, "W3": W3}


# ----------------------------------------------------------------------------
# Per-step wrapper
# ----------------------------------------------------------------------------
@functools.partial(jax.jit, static_argnames=("dims",))
def sse_dynamic_augmentation(x, u, prepped, dims):
    Nx, Nxh, Nu, Ny, Nz, Nw = dims
    B = x.shape[0]

    # Input split / concat is free XLA glue outside the kernel (no in-kernel
    # lane slicing of refs).
    xu = jnp.concatenate([x[:, :Nx], u], axis=-1).astype(jnp.float32)  # (B, Nx+Nu)
    xl = x[:, Nx:Nx + Nxh].astype(jnp.float32)                         # (B, Nxh)

    # Batch tiling: a single block for small B; pipelined batch tiles
    # (parallel -> megacore-shardable on v7x) for large B.
    TB = B if B <= 512 else 512
    grid = (pl.cdiv(B, TB),)

    def act_spec(width):
        return pl.BlockSpec((TB, width), lambda i: (i, 0))

    def const_spec(shape):
        # Weights/biases: constant index_map, stay VMEM-resident across tiles.
        return pl.BlockSpec(shape, lambda i: (0, 0))

    kernel = functools.partial(_sse_dyn_aug_kernel, nz=Nz, nw=Nw)

    fh, xl_plus = pl.pallas_call(
        kernel,
        out_shape=(
            jax.ShapeDtypeStruct((B, Nx + Ny), jnp.float32),
            jax.ShapeDtypeStruct((B, Nxh), jnp.float32),
        ),
        grid=grid,
        in_specs=[
            act_spec(Nx + Nu),
            act_spec(Nxh),
            const_spec(prepped["W1"].shape),
            const_spec(prepped["W2x"].shape),
            const_spec(prepped["W2z"].shape),
            const_spec(prepped["b2"].shape),
            const_spec(prepped["W3"].shape),
        ],
        out_specs=(
            act_spec(Nx + Ny),
            act_spec(Nxh),
        ),
        compiler_params=pltpu.CompilerParams(dimension_semantics=("parallel",)),
    )(xu, xl, prepped["W1"], prepped["W2x"], prepped["W2z"], prepped["b2"],
      prepped["W3"])

    # Final splits/concat are wrapper-side XLA glue (lane-dense kernel stores).
    x_known_plus = fh[:, :Nx]
    y_k = fh[:, Nx:]
    x_plus = jnp.concatenate([x_known_plus, xl_plus], axis=-1)
    return y_k, x_plus


# ----------------------------------------------------------------------------
# Pure-JAX reference (original, unfused math) for the correctness check
# ----------------------------------------------------------------------------
def reference(x, u, p, dims):
    Nx, Nxh, Nu, Ny, Nz, Nw = dims
    xk, xl = x[:, :Nx], x[:, -Nxh:]
    z = xk @ p["Cz"].T + u @ p["Dzu"].T
    xl_plus = jnp.tanh(xl @ p["Whx"].T + z @ p["Whz"].T + p["bh"])
    w = xl @ p["Wwx"].T + z @ p["Wwz"].T + p["bw"]
    xk_plus = xk @ p["A"].T + u @ p["Bm"].T + w @ p["Bw"].T
    y_k = xk @ p["C"].T + u @ p["D"].T + w @ p["Dyw"].T
    return y_k, jnp.concatenate([xk_plus, xl_plus], axis=-1)


# ----------------------------------------------------------------------------
# Main
# ----------------------------------------------------------------------------
if __name__ == "__main__":
    # small, forward-consistent sizes
    B, Nx, Nxh, Nu, Ny, Nz, Nw = 8, 8, 16, 4, 4, 8, 8
    isf = 0.001  # initial_scaling_factor

    key = jax.random.PRNGKey(0)
    ks = jax.random.split(key, 16)
    unif = lambda k, shp: jax.random.uniform(k, shp, dtype=jnp.float32)

    params = {
        # nn.Parameter(initial_scaling_factor * torch.rand(...)) analogues
        "Bw":  isf * unif(ks[0], (Nx, Nw)),
        "Cz":  isf * unif(ks[1], (Nz, Nx)),
        "Dzu": isf * unif(ks[2], (Nz, Nu)),
        "Dyw": isf * unif(ks[3], (Ny, Nw)),
        # TODO(synk): known_system & wnet are abstract in deepSI; deterministic
        # linear / RNN-style surrogates are used here (shapes from __init__).
        "A":   0.1 * unif(ks[4], (Nx, Nx)),
        "Bm":  0.1 * unif(ks[5], (Nx, Nu)),
        "C":   0.1 * unif(ks[6], (Ny, Nx)),
        "D":   0.1 * unif(ks[7], (Ny, Nu)),   # feedthrough=True
        "Whx": 0.1 * unif(ks[8], (Nxh, Nxh)),
        "Whz": 0.1 * unif(ks[9], (Nxh, Nz)),
        "bh":  0.1 * unif(ks[10], (Nxh,)),
        "Wwx": 0.1 * unif(ks[11], (Nw, Nxh)),
        "Wwz": 0.1 * unif(ks[12], (Nw, Nz)),
        "bw":  0.1 * unif(ks[13], (Nw,)),
    }

    x = jax.random.normal(ks[14], (B, Nx + Nxh), dtype=jnp.float32)
    u = jax.random.normal(ks[15], (B, Nu), dtype=jnp.float32)

    dims = (Nx, Nxh, Nu, Ny, Nz, Nw)

    # One-time weight fusion / transpose (hoisted out of the per-step call).
    prepped = jax.tree.map(jax.block_until_ready, prepare_params(params))

    y_k, x_plus = sse_dynamic_augmentation(x, u, prepped, dims)
    jax.block_until_ready((y_k, x_plus))

    y_ref, xp_ref = reference(x, u, params, dims)
    np.testing.assert_allclose(np.asarray(y_k), np.asarray(y_ref), rtol=1e-4, atol=1e-5)
    np.testing.assert_allclose(np.asarray(x_plus), np.asarray(xp_ref), rtol=1e-4, atol=1e-5)

    assert y_k.shape == (B, Ny) and x_plus.shape == (B, Nx + Nxh)
    print("KERNEL_OK")
</pallas_src>

<mosaic_0001>
module attributes {stable_mosaic.version = 11 : i64} {
  func.func @_sse_dyn_aug_kernel(%arg0: i32, %arg1: memref<8x12xf32, #tpu.memory_space<vmem>>, %arg2: memref<8x16xf32, #tpu.memory_space<vmem>>, %arg3: memref<12x20xf32, #tpu.memory_space<vmem>>, %arg4: memref<16x24xf32, #tpu.memory_space<vmem>>, %arg5: memref<8x24xf32, #tpu.memory_space<vmem>>, %arg6: memref<1x24xf32, #tpu.memory_space<vmem>>, %arg7: memref<8x12xf32, #tpu.memory_space<vmem>>, %arg8: memref<8x12xf32, #tpu.memory_space<vmem>>, %arg9: memref<8x16xf32, #tpu.memory_space<vmem>>) attributes {dimension_semantics = [#tpu.dimension_semantics<parallel>], iteration_bounds = array<i64: 1>, scalar_prefetch = 0 : i64, scratch_operands = 0 : i64, tpu.core_type = #tpu.core_type<tc>, window_params = [{transform_indices = @transform_0, window_bounds = array<i64: 8, 12>}, {transform_indices = @transform_1, window_bounds = array<i64: 8, 16>}, {pipeline_mode = #tpu.pipeline_mode<synchronous>, transform_indices = @transform_2, window_bounds = array<i64: 12, 20>}, {pipeline_mode = #tpu.pipeline_mode<synchronous>, transform_indices = @transform_3, window_bounds = array<i64: 16, 24>}, {pipeline_mode = #tpu.pipeline_mode<synchronous>, transform_indices = @transform_4, window_bounds = array<i64: 8, 24>}, {pipeline_mode = #tpu.pipeline_mode<synchronous>, transform_indices = @transform_5, window_bounds = array<i64: 1, 24>}, {pipeline_mode = #tpu.pipeline_mode<synchronous>, transform_indices = @transform_6, window_bounds = array<i64: 8, 12>}, {transform_indices = @transform_7, window_bounds = array<i64: 8, 12>}, {transform_indices = @transform_8, window_bounds = array<i64: 8, 16>}]} {
    %c0 = arith.constant 0 : index
    %c0_0 = arith.constant 0 : index
    %0 = vector.load %arg1[%c0, %c0_0] : memref<8x12xf32, #tpu.memory_space<vmem>>, vector<8x12xf32>
    %c0_1 = arith.constant 0 : index
    %c0_2 = arith.constant 0 : index
    %1 = vector.load %arg2[%c0_1, %c0_2] : memref<8x16xf32, #tpu.memory_space<vmem>>, vector<8x16xf32>
    %c0_3 = arith.constant 0 : index
    %c0_4 = arith.constant 0 : index
    %2 = vector.load %arg3[%c0_3, %c0_4] : memref<12x20xf32, #tpu.memory_space<vmem>>, vector<12x20xf32>
    %cst = arith.constant dense<0.000000e+00> : vector<8x20xf32>
    %3 = tpu.matmul %0, %2, %cst {dimension_numbers = #tpu.dot_dimension_numbers<[1], [0], [0], [1], [0, 0, 1, 1], [], []>} : vector<8x12xf32>, vector<12x20xf32>, vector<8x20xf32> -> vector<8x20xf32>
    %4 = vector.extract_strided_slice %3 {offsets = [0, 0], sizes = [8, 8], strides = [1, 1]} : vector<8x20xf32> to vector<8x8xf32>
    %5 = vector.extract_strided_slice %3 {offsets = [0, 8], sizes = [8, 12], strides = [1, 1]} : vector<8x20xf32> to vector<8x12xf32>
    %c0_5 = arith.constant 0 : index
    %c0_6 = arith.constant 0 : index
    %6 = vector.load %arg4[%c0_5, %c0_6] : memref<16x24xf32, #tpu.memory_space<vmem>>, vector<16x24xf32>
    %cst_7 = arith.constant dense<0.000000e+00> : vector<8x24xf32>
    %7 = tpu.matmul %1, %6, %cst_7 {dimension_numbers = #tpu.dot_dimension_numbers<[1], [0], [0], [1], [0, 0, 1, 1], [], []>} : vector<8x16xf32>, vector<16x24xf32>, vector<8x24xf32> -> vector<8x24xf32>
    %c0_8 = arith.constant 0 : index
    %c0_9 = arith.constant 0 : index
    %8 = vector.load %arg5[%c0_8, %c0_9] : memref<8x24xf32, #tpu.memory_space<vmem>>, vector<8x24xf32>
    %cst_10 = arith.constant dense<0.000000e+00> : vector<8x24xf32>
    %9 = tpu.matmul %4, %8, %cst_10 {dimension_numbers = #tpu.dot_dimension_numbers<[1], [0], [0], [1], [0, 0, 1, 1], [], []>} : vector<8x8xf32>, vector<8x24xf32>, vector<8x24xf32> -> vector<8x24xf32>
    %10 = arith.addf %7, %9 : vector<8x24xf32>
    %c0_11 = arith.constant 0 : index
    %c0_12 = arith.constant 0 : index
    %11 = vector.load %arg6[%c0_11, %c0_12] : memref<1x24xf32, #tpu.memory_space<vmem>>, vector<1x24xf32>
    %12 = vector.broadcast %11 : vector<1x24xf32> to vector<8x24xf32>
    %13 = arith.addf %10, %12 : vector<8x24xf32>
    %14 = vector.extract_strided_slice %13 {offsets = [0, 0], sizes = [8, 8], strides = [1, 1]} : vector<8x24xf32> to vector<8x8xf32>
    %15 = vector.extract_strided_slice %13 {offsets = [0, 8], sizes = [8, 16], strides = [1, 1]} : vector<8x24xf32> to vector<8x16xf32>
    %16 = math.tanh %15 : vector<8x16xf32>
    %c0_13 = arith.constant 0 : index
    %c0_14 = arith.constant 0 : index
    %17 = vector.load %arg7[%c0_13, %c0_14] : memref<8x12xf32, #tpu.memory_space<vmem>>, vector<8x12xf32>
    %cst_15 = arith.constant dense<0.000000e+00> : vector<8x12xf32>
    %18 = tpu.matmul %14, %17, %cst_15 {dimension_numbers = #tpu.dot_dimension_numbers<[1], [0], [0], [1], [0, 0, 1, 1], [], []>} : vector<8x8xf32>, vector<8x12xf32>, vector<8x12xf32> -> vector<8x12xf32>
    %19 = arith.addf %5, %18 : vector<8x12xf32>
    %c0_16 = arith.constant 0 : index
    %c0_17 = arith.constant 0 : index
    %20 = vector.load %arg8[%c0_16, %c0_17] : memref<8x12xf32, #tpu.memory_space<vmem>>, vector<8x12xf32>
    tpu.vector_store %arg8[%c0_16, %c0_17], %19 {strides = array<i32>} : memref<8x12xf32, #tpu.memory_space<vmem>>, vector<8x12xf32>,
    %c0_18 = arith.constant 0 : index
    %c0_19 = arith.constant 0 : index
    %21 = vector.load %arg9[%c0_18, %c0_19] : memref<8x16xf32, #tpu.memory_space<vmem>>, vector<8x16xf32>
    tpu.vector_store %arg9[%c0_18, %c0_19], %16 {strides = array<i32>} : memref<8x16xf32, #tpu.memory_space<vmem>>, vector<8x16xf32>,
    return
  }
  func.func @transform_0(%arg0: i32) -> (i32, i32) {
    %c0_i32 = arith.constant 0 : i32
    %c0_i32_0 = arith.constant 0 : i32
    return %arg0, %c0_i32 : i32, i32
  }
  func.func @transform_1(%arg0: i32) -> (i32, i32) {
    %c0_i32 = arith.constant 0 : i32
    %c0_i32_0 = arith.constant 0 : i32
    return %arg0, %c0_i32 : i32, i32
  }
  func.func @transform_2(%arg0: i32) -> (i32, i32) {
    %c0_i32 = arith.constant 0 : i32
    %c0_i32_0 = arith.constant 0 : i32
    %c0_i32_1 = arith.constant 0 : i32
    return %c0_i32, %c0_i32_0 : i32, i32
  }
  func.func @transform_3(%arg0: i32) -> (i32, i32) {
    %c0_i32 = arith.constant 0 : i32
    %c0_i32_0 = arith.constant 0 : i32
    %c0_i32_1 = arith.constant 0 : i32
    return %c0_i32, %c0_i32_0 : i32, i32
  }
  func.func @transform_4(%arg0: i32) -> (i32, i32) {
    %c0_i32 = arith.constant 0 : i32
    %c0_i32_0 = arith.constant 0 : i32
    %c0_i32_1 = arith.constant 0 : i32
    return %c0_i32, %c0_i32_0 : i32, i32
  }
  func.func @transform_5(%arg0: i32) -> (i32, i32) {
    %c0_i32 = arith.constant 0 : i32
    %c0_i32_0 = arith.constant 0 : i32
    %c0_i32_1 = arith.constant 0 : i32
    return %c0_i32, %c0_i32_0 : i32, i32
  }
  func.func @transform_6(%arg0: i32) -> (i32, i32) {
    %c0_i32 = arith.constant 0 : i32
    %c0_i32_0 = arith.constant 0 : i32
    %c0_i32_1 = arith.constant 0 : i32
    return %c0_i32, %c0_i32_0 : i32, i32
  }
  func.func @transform_7(%arg0: i32) -> (i32, i32) {
    %c0_i32 = arith.constant 0 : i32
    %c0_i32_0 = arith.constant 0 : i32
    return %arg0, %c0_i32 : i32, i32
  }
  func.func @transform_8(%arg0: i32) -> (i32, i32) {
    %c0_i32 = arith.constant 0 : i32
    %c0_i32_0 = arith.constant 0 : i32
    return %arg0, %c0_i32 : i32, i32
  }
}

</mosaic_0001>

<bundles_post_ra>
// kernel: sse_dynamic_augmentation.1
= control target key start
LH: loop header
LB: loop body
LE: loop exit
PB: predicated region body
PF: predicated region fallthrough
CT: control target
= control target key end

     0   :  { %vm36_vm0 = vcmask 1043456   ;;  %v413_v0 = vmov 0.0   ;;  %vm414_vm1 = vmmov 0   ;;  %vm32_vm2 = vcmask 97280   ;;  %s416_s20 = smov 8   ;;  %s505_s2 = inlined_call_operand.vmem [shape: f32[12,20], index: 2, kind: input, shape index: {}]   ;;  %s506_s0 = inlined_call_operand.vmem [shape: f32[8,12], index: 0, kind: input, shape index: {}]   ;;  %s507_s4 = inlined_call_operand.vmem [shape: f32[8,24], index: 4, kind: input, shape index: {}]   ;;  %s508_s3 = inlined_call_operand.vmem [shape: f32[16,24], index: 3, kind: input, shape index: {}]   ;;  %s509_s1 = inlined_call_operand.vmem [shape: f32[8,16], index: 1, kind: input, shape index: {}]   ;;  %s510_s6 = inlined_call_operand.vmem [shape: f32[8,12], index: 6, kind: input, shape index: {}]   ;;  %s511_s5 = inlined_call_operand.vmem [shape: f32[1,24], index: 5, kind: input, shape index: {}]   ;;  %s512_s8 = inlined_call_operand.vmem [shape: f32[8,16], index: 8, kind: output, shape index: {1}]   ;;  %s513_s7 = inlined_call_operand.vmem [shape: f32[8,12], index: 7, kind: output, shape index: {0}]  }
   0x1   :  { %383 = vmatprep.subr.mxu0 %v413_v0  ;;  %v31_v1 = vld [vmem:[%s505_s2 + $0x8] sm:$0xf]  ;;  %v30_v2 = vld [vmem:[%s505_s2] sm:$0xff]  ;;  %387 = vmatprep.mubr.msk.f32.mxu0 %vm414_vm1, %v413_v0  ;;  %vm113_vm3 = vcmask 64512   ;;  %vm187_vm4 = vcmask 130048  }
   0x2   :  { %384 = vmatpush3.msk.msra.mxu0 %vm36_vm0, %v31_v1  ;;  %v28_v3 = vld [vmem:[%s506_s0] sm:$0xff]  ;;  %390 = vmatprep.subr.mxu1 %v413_v0  ;;  %v111_v5 = vld [vmem:[%s508_s3 + $0x8] sm:$0xff] }
   0x3   :  { %v112_v4 = vld [vmem:[%s507_s4] sm:$0xff]  ;;  %385 = vmatprep.subr.mxu0 %v413_v0  ;;  %392 = vmatprep.mubr.msk.f32.mxu1 %vm414_vm1, %v413_v0 }
   0x4   :  { %391 = vmatpush3.msra.mxu1 %v112_v4  ;;  %386 = vmatpush3.msra.mxu0 %v30_v2  ;;  %v110_v7 = vld [vmem:[%s508_s3] sm:$0xff] }
   0x5   :  { %388 = vmatmul.mubr.msk.f32.vlgmr.msra.gmra.mxu0 %vm32_vm2, %v28_v3  ;;  %395 = vmatprep.subr.mxu1 %v413_v0  ;;  %v29_v9 = vld [vmem:[%s509_s1] sm:$0xff]  ;;  %s415_s1 = smov 120  }
   0x6   :  { %402 = vmatprep.subr.mxu0 %v413_v0  ;;  %404 = vmatprep.mubr.msk.f32.mxu0 %vm414_vm1, %v413_v0  ;;  %v270_v10 = vld [vmem:[%s510_s6] sm:$0xff] }
   0x7   :  { %403 = vmatpush3.msra.mxu0 %v270_v10  ;;  %v371_v14 = vld [vmem:[%s511_s5] ss:$0 sm:$0xff] }
  0xc5   :  { %v106_v6 = vpop.f32.mrf.mxu0 }
  0xc6   :  { %393 = vmatmul.mubr.msk.f32.vlgmr.msra.gmra.mxu1 %vm113_vm3, %v106_v6 }
  0xc7   :  { %396 = vmatpush3.msra.mxu1 %v111_v5  ;;  %v389_v8 = vpop.f32.mrf.mxu0  ;;  %399 = vmatprep.mubr.msk.f32.mxu1 %vm414_vm1, %v413_v0 }
  0xc8   :  { %397 = vmatprep.subr.mxu1 %v413_v0 }
  0xc9   :  { %398 = vmatpush3.msra.mxu1 %v110_v7 }
  0xca   :  { %400 = vmatmul.mubr.msk.f32.vlgmr.msra.gmra.mxu1 %vm187_vm4, %v29_v9 }
 0x186   :  { %v183_v11 = vpop.f32.mrf.mxu1 }
 0x188   :  { %v394_v12 = vpop.f32.mrf.mxu1 }
 0x18a   :  { %v257_v13 = vpop.f32.mrf.mxu1 }
 0x18b   :  { %v258_v15 = vadd.f32 %v257_v13, %v183_v11 }
 0x18c   :  { %v401_v16 = vpop.f32.mrf.mxu1 }
 0x18d   :  { %v268_v17 = vadd.f32 %v371_v14, %v258_v15 }
 0x18f   :  { %411 = vtanh.f32 %v268_v17  ;;  %405 = vmatmul.mubr.msk.f32.vlgmr.msra.gmra.mxu0 %vm113_vm3, %v268_v17 }
 0x19c   :  { %v412_v18 = vpop.eup %411 }
 0x19d   :  { %355 = vrot.lane.b32.xlu1 %v412_v18, %s415_s1 }
 0x20f   :  { %v356_v19 = vpop.permute.xlu1 %355 }
 0x210   :  { %358 = vst.msk [vmem:[%s512_s8] sm:$0xff] %vm187_vm4, %v356_v19 }
 0x24f   :  { %v340_v20 = vpop.f32.mrf.mxu0 }
 0x250   :  { %345 = vrot.lane.b32.xlu0 %v340_v20, %s416_s20 }
 0x251   :  { %v406_v21 = vpop.f32.mrf.mxu0 }
 0x2c2   :  { %v346_v22 = vpop.permute.xlu0 %345 }
 0x2c3   :  { %v348_v23 = vadd.f32 %v346_v22, %v106_v6 }
 0x2c5   :  { %350 = vrot.lane.b32.xlu0 %v348_v23, %s415_s1 }
 0x337   :  { %v351_v24 = vpop.permute.xlu0 %350 }
 0x338   :  { %353 = vst.msk [vmem:[%s513_s7] sm:$0xff] %vm32_vm2, %v351_v24 }

</bundles_post_ra>
